<compile_context>
chip_gen: v7x
topology: tpu7x:2x2x1
jax: 0.10.0
libtpu: 0.0.40
codegen_flags: <defaults>
</compile_context>

<pallas_src>
import numpy as np
import jax
import jax.numpy as jnp
from jax.experimental import pallas as pl
from jax.experimental.pallas import tpu as pltpu


def _drop_path_kernel(scale_ref, x_ref, o_ref):
    # Pure streaming multiply: (rows, tile_c) * (rows, 1) broadcast. No MXU, trivial VPU.
    o_ref[...] = x_ref[...] * scale_ref[...]


def drop_path(x, drop_prob, *, seed=0, training=True):
    """Per-sample stochastic depth, matching torch drop_path semantics."""
    if drop_prob is None or float(drop_prob) == 0.0 or not training:
        return x
    drop_prob = float(drop_prob)
    if not (0.0 < drop_prob < 1.0):
        raise ValueError(f"drop_prob must be in [0, 1), got {drop_prob}")
    keep_prob = 1.0 - drop_prob

    Bn = int(x.shape[0])
    D = int(np.prod(x.shape[1:]))
    itemsize = jnp.dtype(x.dtype).itemsize

    # ---- per-sample Bernoulli(keep_prob) scale in plain JAX (negligible HBM traffic).
    # Matches torch: floor(keep_prob + U[0,1)), then the /keep_prob is folded in here.
    key = jax.random.PRNGKey(seed)
    u = jax.random.uniform(key, (Bn, 1), dtype=jnp.float32)
    keep = jnp.floor(keep_prob + u)                        # 0./1., P(1) = keep_prob
    scale = (keep * (1.0 / keep_prob)).astype(x.dtype)     # (B, 1), divide folded at trace time

    # ---- layout: flatten, pad lane axis to a 128 multiple, repack rows for sublane density.
    x2 = x.reshape(Bn, D)
    D_pad = ((D + 127) // 128) * 128
    if D_pad != D:
        x2 = jnp.pad(x2, ((0, 0), (0, D_pad - D)))
    m = D_pad // 128

    r = 1
    if Bn < 8:
        # smallest r (dividing D_pad/128) giving >= 8 live sublanes per vreg
        for cand in range(1, m + 1):
            if m % cand == 0 and Bn * cand >= 8:
                r = cand
                break
        else:
            r = m
    rows = Bn * r
    cols = D_pad // r
    x2 = x2.reshape(rows, cols)
    scale_rows = jnp.repeat(scale, r, axis=0)              # (rows, 1): sub-rows share the sample scale

    # ---- lane tiling by byte budget (~3 MiB/block => <= ~12 MiB resident, double-buffered in+out).
    budget = 3 * 1024 * 1024
    max_tile = max(128, (budget // (rows * itemsize)) // 128 * 128)
    start = min(max_tile, cols)
    start -= start % 128
    tile_c = 128
    for cand in range(start, 127, -128):                   # largest 128-multiple dividing cols
        if cols % cand == 0:
            tile_c = cand
            break
    n_tiles = cols // tile_c
    # v7x has 2 TensorCores: prefer >= 2 grid steps on the "parallel" axis.
    if n_tiles == 1 and cols % 256 == 0:
        tile_c = cols // 2
        n_tiles = 2

    out2 = pl.pallas_call(
        _drop_path_kernel,
        out_shape=jax.ShapeDtypeStruct((rows, cols), x.dtype),
        grid=(n_tiles,),
        in_specs=[
            pl.BlockSpec((rows, 1), lambda t: (0, 0)),       # tiny per-row scale, same block every step
            pl.BlockSpec((rows, tile_c), lambda t: (0, t)),  # lane-dense activation tile
        ],
        out_specs=pl.BlockSpec((rows, tile_c), lambda t: (0, t)),
        compiler_params=pltpu.CompilerParams(
            dimension_semantics=("parallel",),
            vmem_limit_bytes=32 * 1024 * 1024,
        ),
        cost_estimate=pl.CostEstimate(
            flops=rows * cols,
            transcendentals=0,
            bytes_accessed=(2 * rows * cols + rows) * itemsize,
        ),
    )(scale_rows, x2)

    out2 = out2.reshape(Bn, D_pad)
    if D_pad != D:
        out2 = out2[:, :D]
    return out2.reshape(x.shape)


class DropPath:
    """Mirror of the PyTorch nn.Module: DropPath(p)(x)."""

    def __init__(self, drop_prob=None):
        self.drop_prob = drop_prob
        self.training = True

    def __call__(self, x, seed=0):
        # TODO(synk): torch's global RNG stream is not reproducible here; the JAX PRNG gives the
        # same Bernoulli(keep_prob) per-sample mask distribution, keyed deterministically by `seed`.
        return drop_path(x, self.drop_prob, seed=seed, training=self.training)


if __name__ == "__main__":
    key = jax.random.PRNGKey(0)
    x = jax.random.normal(key, (2, 4, 16, 16), jnp.float32)   # (batch, channels, H, W)
    drop_prob = 0.25
    keep_prob = 1.0 - drop_prob

    dp = DropPath(drop_prob)

    # eval mode -> identity (matches `not self.training` branch; no kernel launch)
    dp.training = False
    y_eval = jax.block_until_ready(dp(x, seed=0))
    assert np.allclose(np.asarray(y_eval), np.asarray(x)), "eval path must be identity"

    # train mode -> each sample is either all-zero (dropped) or x / keep_prob (kept)
    dp.training = True
    y = jax.block_until_ready(dp(x, seed=1234))
    y_np, x_np = np.asarray(y), np.asarray(x)
    assert y_np.shape == x_np.shape
    for b in range(x.shape[0]):
        if np.all(y_np[b] == 0.0):
            continue                                          # sample dropped
        assert np.allclose(y_np[b], x_np[b] / keep_prob, rtol=1e-6, atol=1e-6), \
            f"sample {b}: kept sample must equal x / keep_prob"

    # determinism: same seed -> same mask
    y2 = jax.block_until_ready(dp(x, seed=1234))
    assert np.allclose(np.asarray(y2), y_np)

    print("KERNEL_OK")
</pallas_src>

<mosaic_0001>
module attributes {stable_mosaic.version = 11 : i64} {
  func.func @_drop_path_kernel(%arg0: i32, %arg1: memref<8x1xf32, #tpu.memory_space<vmem>>, %arg2: memref<8x128xf32, #tpu.memory_space<vmem>>, %arg3: memref<8x128xf32, #tpu.memory_space<vmem>>) attributes {dimension_semantics = [#tpu.dimension_semantics<parallel>], iteration_bounds = array<i64: 2>, scalar_prefetch = 0 : i64, scratch_operands = 0 : i64, tpu.core_type = #tpu.core_type<tc>, window_params = [{pipeline_mode = #tpu.pipeline_mode<synchronous>, transform_indices = @transform_0, window_bounds = array<i64: 8, 1>}, {transform_indices = @transform_1, window_bounds = array<i64: 8, 128>}, {transform_indices = @transform_2, window_bounds = array<i64: 8, 128>}]} {
    %c0 = arith.constant 0 : index
    %c0_0 = arith.constant 0 : index
    %0 = vector.load %arg2[%c0, %c0_0] : memref<8x128xf32, #tpu.memory_space<vmem>>, vector<8x128xf32>
    %c0_1 = arith.constant 0 : index
    %c0_2 = arith.constant 0 : index
    %1 = vector.load %arg1[%c0_1, %c0_2] : memref<8x1xf32, #tpu.memory_space<vmem>>, vector<8x1xf32>
    %2 = vector.broadcast %1 : vector<8x1xf32> to vector<8x128xf32>
    %3 = arith.mulf %0, %2 : vector<8x128xf32>
    %c0_3 = arith.constant 0 : index
    %c0_4 = arith.constant 0 : index
    %4 = vector.load %arg3[%c0_3, %c0_4] : memref<8x128xf32, #tpu.memory_space<vmem>>, vector<8x128xf32>
    tpu.vector_store %arg3[%c0_3, %c0_4], %3 {strides = array<i32>} : memref<8x128xf32, #tpu.memory_space<vmem>>, vector<8x128xf32>,
    return
  }
  func.func @transform_0(%arg0: i32) -> (i32, i32) {
    %c0_i32 = arith.constant 0 : i32
    %c0_i32_0 = arith.constant 0 : i32
    %c0_i32_1 = arith.constant 0 : i32
    return %c0_i32, %c0_i32_0 : i32, i32
  }
  func.func @transform_1(%arg0: i32) -> (i32, i32) {
    %c0_i32 = arith.constant 0 : i32
    %c0_i32_0 = arith.constant 0 : i32
    return %c0_i32, %arg0 : i32, i32
  }
  func.func @transform_2(%arg0: i32) -> (i32, i32) {
    %c0_i32 = arith.constant 0 : i32
    %c0_i32_0 = arith.constant 0 : i32
    return %c0_i32, %arg0 : i32, i32
  }
}

</mosaic_0001>

<bundles_post_ra>
// kernel: tpu_custom_call.1
= control target key start
LH: loop header
LB: loop body
LE: loop exit
PB: predicated region body
PF: predicated region fallthrough
CT: control target
= control target key end

     0   :  { %7 = vsyncpa [#allocation3], 0  ;;  %s592_s0 = inlined_call_operand.vmem [shape: f32[8,1], index: 0, kind: input, shape index: {}]   ;;  %s593_s1 = inlined_call_operand.hbm [shape: f32[8,256], index: 1, kind: input, shape index: {}]   ;;  %s594_s2 = inlined_call_operand.hbm [shape: f32[8,256], index: 2, kind: output, shape index: {}]  }
   0x1   :  { %9 = vsyncpa [#allocation3 + $0x1], 0 }
   0x2   :  { %10 = vsyncpa [#allocation4], 0 }
   0x3   :  { %12 = vsyncpa [#allocation4 + $0x1], 0  ;;  %s428_s9 = smov 0   ;;  %s430_s10 = smov 0  }
   0x4   :  { %s432_s11 = smov 0   ;;  %s434_s12 = smov 0  }
   0x5 LB: > { %s449_s13 = sadd.s32 4294967295, %s408_s12   ;;  %s252_s14 = sadd.s32 4294967294, %s408_s12   ;;  %s408_s12 = sphi %s434_s12, %s609_s12   ;;  %s404_s11 = sphi %s432_s11, %s608_s11   ;;  %s400_s10 = sphi %s430_s10, %s607_s10   ;;  %s396_s9 = sphi %s428_s9, %s606_s9  }
   0x6   : > { %s453_s15 = sadd.s32 1, %s408_s12   ;;  %s46_s16 = sadd.s32 1, %s404_s11 }
   0x7   : > { %s43_s17 = ssub.s32 %s408_s12, %s453_s15  ;;  %p53_p0 = scmp.ne.s32.totalorder %s404_s11, %s400_s10 }
   0x8   : > { %p44_p1 = scmp.eq.s32.totalorder %s43_s17, 0  ;;  %p54_p2 = scmp.eq.s32.totalorder %s408_s12, 0 }
   0x9   : > { %p59_p3 = scmp.ne.s32.totalorder %s400_s10, %s396_s9  ;;  %p60_p4 = scmp.eq.s32.totalorder %s449_s13, 0 }
   0xa   : > { %s465_s18 = scalar_select %p44_p1, %s404_s11, %s46_s16  }
   0xb   : > { %p467_p5 = por %p54_p2, %p53_p0  ;;  %p471_p6 = por %p60_p4, %p59_p3 }
   0xc   : > { %p83_p7 = scmp.eq.s32.totalorder %s449_s13, 1  ;;  %p89_p8 = scmp.eq.s32.totalorder %s252_s14, 1 }
   0xd   : > { %p276_p10 = scmp.lt.s32.totalorder %s408_s12, 2  ;;  %s112_s23 = sand.u32 1, %s404_s11  }
   0xe   : > { %p478_p11 = por %p83_p7, %p53_p0  ;;  %p482_p12 = por %p89_p8, %p59_p3 }
   0xf   : > { %s256_s24 = sshll.u32 %s408_s12, 7  ;;  %s255_s25 = sshll.u32 %s112_s23, 3 }
  0x10   : > { %s598_s21 = scalar_select %p478_p11, 1, 0 }
  0x11   : > { %s599_s22 = scalar_select %p482_p12, 1, 0 }
  0x12   : > { %s491_s28 = scalar_lea.hbm %s593_s1, %s256_s24  ;;  %s116_s29 = scalar_lea.vmem [#allocation2], %s255_s25 }
  0x13   : > { %s123_s30 = sshll.u32 %s116_s29, 4  ;;  %p495_p13 = pnand %p276_p10, %p467_p5  ;;  %s499_s30 = int_to_ptr.vmem [resolvable:$true] %s123_s30 }
  0x14   : > { %s113_s4 = scalar_lea.sflag [#allocation3], %s112_s23  ;;  %s312_s5 = scalar_lea.hbm %s491_s28, 128 }
  0x15   : > { %p313_p2 = scmp.ne.s32.totalorder %s491_s28, %s312_s5  ;;  %p314_p3 = pneg %p495_p13 }
  0x16   : > { %s317_s8 = scalar_lea.hbm %s593_s1, 256  ;;  %p318_p5 = scmp.lt.u32.totalorder %s491_s28, %s593_s1 }
  0x17   : > { %p315_p4 = pnand %p314_p3, %p313_p2  ;;  %p319_p8 = scmp.lt.u32.totalorder %s317_s8, %s312_s5 }
  0x18   : > { %p321_p9 = scmp.lt.u32.totalorder %s312_s5, %s491_s28 }
  0x19   : > { %p316_p7 = pneg %p315_p4  ;;  %p320_p10 = por %p319_p8, %p318_p5 }
  0x1b   : > { %p322_p0 = por %p321_p9, %p320_p10 }
  0x1d   : > { %p323_p1 = pnand %p322_p0, %p316_p7 }
  0x1f   : > { %326 = shalt.err (!%p323_p1)
}
  0x20   : > { %s327_s17 = scalar_lea.vmem %s499_s30, 128  ;;  %s410_s19 = smov [#allocation2]  }
  0x21   : > { %p328_p2 = scmp.ne.s32.totalorder %s499_s30, %s327_s17  ;;  %s332_s23 = sshll.u32 %s410_s19, 4  ;;  %s333_s23 = int_to_ptr.vmem [resolvable:$false] %s332_s23 }
  0x22   : > { %s334_s24 = scalar_lea.vmem %s333_s23, 256  ;;  %p335_p11 = scmp.lt.s32.totalorder %s499_s30, %s333_s23 }
  0x23   : > { %p330_p4 = pnand %p328_p2, %p314_p3  ;;  %p336_p5 = scmp.lt.s32.totalorder %s334_s24, %s327_s17 }
  0x25   : > { %p331_p12 = pneg %p330_p4  ;;  %p337_p8 = por %p336_p5, %p335_p11 }
  0x27   : > { %p338_p9 = pnand %p337_p8, %p331_p12 }
  0x29   : > { %341 = shalt.err (!%p338_p9)
}
  0x2a   : > { %271 = dma.hbm_to_vmem [thread:$0]  (!%p495_p13), %s491_s28, 128, %s499_s30, %s113_s4  }
  0x2b   : > { %p601_p0 = scmp.lt.s32.totalorder %s408_s12, 3  ;;  %p602_p1 = scmp.ge.s32.totalorder %s408_s12, 1 }
  0x2d   : > { %p129_p3 = pnand %p602_p1, %p601_p0 }
  0x2e   : > { %s533_s25 = sand.u32 (!%p129_p3), 1, %s400_s10  }
  0x2f   : > { %132 = sbr.rel (%p129_p3) target bundleno = 201 (0xc9), region = 28  ;;  %s258_s26 = sshll.u32 (!%p129_p3), %s533_s25, 3 }
  0x30   : > { %s135_s27 = scalar_lea.sflag (!%p129_p3), [#allocation3], %s533_s25  ;;  %s138_s29 = scalar_lea.vmem (!%p129_p3), [#allocation2], %s258_s26 }
  0x36   : > { %387 = dma.done.wait (%p471_p6), %s135_s27, 128  }
  0x37   : > { %389 = vsyncadd (%p471_p6), %s135_s27, 4294967168  ;;  %v411_v0 = vmov 0   ;;  %v160_v1 = vld [vmem:[%s592_s0] sm:$0xff]  ;;  %s261_s3 = sshll.u32 %s449_s13, 7  ;;  %s158_s4 = scalar_lea.vmem [#allocation5], %s258_s26 }
  0x38   : > { %311 = vset.pattern.permute.xlu0 %v411_v0  ;;  %v159_v2 = vld [vmem:[%s138_s29] sm:$0xff]  ;;  %s182_s5 = sshll.u32 %s158_s4, 4  ;;  %s548_s20 = scalar_lea.hbm %s594_s2, %s261_s3  ;;  %s550_s5 = int_to_ptr.vmem [resolvable:$true] %s182_s5 }
  0x39   : > { %163 = vperm.xlu0 %311, %v160_v1   ;;  %s169_s8 = scalar_lea.sflag [#allocation4], %s533_s25  ;;  %s342_s14 = scalar_lea.vmem %s550_s5, 128 }
  0x3a   : > { %p343_p6 = scmp.ne.s32.totalorder %s550_s5, %s342_s14  ;;  %p603_p11 = scmp.ne.s32.totalorder %s598_s21, 0 }
  0x3b   : > { %s412_s13 = smov [#allocation5]  }
  0x3c   : > { %p344_p12 = pnand %p343_p6, %p603_p11  ;;  %s346_s16 = sshll.u32 %s412_s13, 4  ;;  %s347_s16 = int_to_ptr.vmem [resolvable:$false] %s346_s16 }
  0x3d   : > { %s348_s17 = scalar_lea.vmem %s347_s16, 256  ;;  %p349_p7 = scmp.lt.s32.totalorder %s550_s5, %s347_s16 }
  0x3e   : > { %p345_p13 = pneg %p344_p12  ;;  %p350_p10 = scmp.lt.s32.totalorder %s348_s17, %s342_s14 }
  0x40   : > { %p351_p2 = por %p350_p10, %p349_p7 }
  0x42   : > { %p352_p4 = pnand %p351_p2, %p345_p13 }
  0xb8   : > { %v164_v3 = vpop.permute.xlu0 %163 }
  0xb9   : > { %v166_v4 = vmul.f32 %v164_v3, %v159_v2 }
  0xbb   : > { %167 = vst [vmem:[%s158_s4] sm:$0xff] %v166_v4 }
  0xbc   : > { %355 = shalt.err (!%p352_p4)
}
  0xbd   : > { %s356_s19 = scalar_lea.hbm %s548_s20, 128  ;;  %s360_s25 = scalar_lea.hbm %s594_s2, 256 }
  0xbe   : > { %p357_p5 = scmp.ne.s32.totalorder %s548_s20, %s356_s19  ;;  %p361_p0 = scmp.lt.u32.totalorder %s548_s20, %s594_s2 }
  0xbf   : > { %p362_p1 = scmp.lt.u32.totalorder %s360_s25, %s356_s19  ;;  %p364_p6 = scmp.lt.u32.totalorder %s356_s19, %s548_s20 }
  0xc0   : > { %p358_p8 = pnand %p357_p5, %p603_p11 }
  0xc1   : > { %p363_p3 = por %p362_p1, %p361_p0 }
  0xc2   : > { %p359_p9 = pneg %p358_p8 }
  0xc3   : > { %p365_p12 = por %p364_p6, %p363_p3 }
  0xc5   : > { %p366_p13 = pnand %p365_p12, %p359_p9 }
  0xc7   : > { %369 = shalt.err (!%p366_p13)
}
  0xc8   : > { %266 = dma.vmem_to_hbm [thread:$0]  (%p603_p11), %s550_s5, 128, %s548_s20, %s169_s8  }
  0xc9 PF: > { %s194_s29 = sand.u32 1, %s396_s9   ;;  %p604_p7 = scmp.ne.s32.totalorder %s599_s22, 0 }
  0xca   : > { %p605_p10 = scmp.ge.s32.totalorder %s408_s12, 2  ;;  %s195_s28 = scalar_lea.sflag [#allocation4], %s194_s29 }
  0xcc   : > { %p273_p2 = pnand %p605_p10, %p604_p7 }
  0xce   : > { %391 = dma.done.wait (!%p273_p2), %s195_s28, 128  }
  0xcf   : > { %393 = vsyncadd (!%p273_p2), %s195_s28, 4294967168  ;;  %p15_p4 = scmp.ge.s32.totalorder %s453_s15, 4   ;;  %s606_s9 = smov %s400_s10 }
  0xd0   : > { %s607_s10 = smov %s404_s11  ;;  %s608_s11 = smov %s465_s18 }
  0xd1   : > { %s609_s12 = smov %s453_s15  ;;  %17 = sbr.rel (!%p15_p4) target bundleno = 5 (0x5), region = 73 }
  0xd8   :  { %200 = vsyncpa [#allocation3], 1 }
  0xd9   :  { %202 = vsyncpa [#allocation3 + $0x1], 1 }
  0xda   :  { %203 = vsyncpa [#allocation4], 1 }
  0xdb   :  { %205 = vsyncpa [#allocation4 + $0x1], 1 }

</bundles_post_ra>
